<compile_context>
chip_gen: v6e
topology: v6e:2x2x1
jax: 0.10.0
libtpu: 0.0.40
codegen_flags: <defaults>
</compile_context>

<pallas_src>
import jax
import jax.numpy as jnp
from jax import lax
from jax.experimental import pallas as pl
from jax.experimental.pallas import tpu as pltpu

LEAKY_SLOPE = 0.01
BN_EPS = 1e-5
K_MAX = 15                       # largest branch kernel; smaller ones zero-padded
HALO = (K_MAX - 1) // 2          # 7
C_PAD_GRANULE = 8                # keeps K*C_pad <= 128 (single MXU pass on v5e);
                                 # use 16 on v6e/v7x for fully bf16-tile-aligned pieces


def _msk_kernel(x_ref, w_ref, sh_ref, o_ref):
    """NB batch elements per grid step.

    x_ref : (NB, C, L)            f32/bf16  input block
    w_ref : (O_total, K*C_pad)    bf16      im2col-flattened, BN-scale-folded weights
    sh_ref: (O_total, 1)          f32       folded conv-bias + BN shift
    o_ref : (NB, O_total, L)      bf16      concatenated block output
    """
    NB, C, L = x_ref.shape
    C_pad = w_ref.shape[1] // K_MAX

    # Hoisted zero tiles (JAX does not CSE broadcasts inside loops).
    zc = jnp.zeros((C_pad - C, L), jnp.bfloat16) if C_pad > C else None
    zh = jnp.zeros((C_pad, HALO), jnp.bfloat16)

    pieces = []
    for n in range(NB):                                   # static, small
        xn = x_ref[n].astype(jnp.bfloat16)                # (C, L) -> bf16 once
        if zc is not None:
            xn = jnp.concatenate([xn, zc], axis=0)        # (C_pad, L)
        xp = jnp.concatenate([zh, xn, zh], axis=1)        # (C_pad, L + 14) in-register halo
        # im2col: 15 shifted windows stacked on sublanes -> (K*C_pad, L), all bf16.
        pieces.append(
            jnp.concatenate([xp[:, j:j + L] for j in range(K_MAX)], axis=0))
    xcol = pieces[0] if NB == 1 else jnp.concatenate(pieces, axis=1)   # (K*C_pad, NB*L)

    # Single MXU matmul, contraction depth K*C_pad, f32 accumulation.
    acc = jnp.dot(w_ref[...], xcol, preferred_element_type=jnp.float32)  # (O_total, NB*L)

    # Epilogue: BN scale already folded into the weights -> add shift, LeakyReLU.
    y = acc + sh_ref[...]                                  # (O_total,1) broadcast over lanes
    y = jnp.maximum(y, LEAKY_SLOPE * y)                    # exact LeakyReLU for slope in (0,1)
    y = y.astype(o_ref.dtype)
    # TODO(synk): Dropout(0.1) is identity in eval mode; train-mode dropout and
    # BatchNorm batch statistics are intentionally not modeled.
    for n in range(NB):
        o_ref[n] = y[:, n * L:(n + 1) * L]


def pack_params(params, c_pad_granule=C_PAD_GRANULE):
    """Fold params into the kernel operand layout (once, outside the hot path)."""
    w_all, scale_all, shift_all = params                   # (O, C, K), (O,), (O,)
    O_total, C, _ = w_all.shape
    C_pad = ((C + c_pad_granule - 1) // c_pad_granule) * c_pad_granule
    # Fold BN scale into the weights in f32, then pad C and quantize to bf16.
    w_scaled = w_all * scale_all[:, None, None]            # (O, C, K) f32
    w_padded = jnp.pad(w_scaled, ((0, 0), (0, C_pad - C), (0, 0)))      # (O, C_pad, K)
    # (O, C_pad, K) -> (O, K, C_pad) -> (O, K*C_pad): column j*C_pad + c matches xcol rows.
    w_flat = w_padded.transpose(0, 2, 1).reshape(O_total, K_MAX * C_pad).astype(jnp.bfloat16)
    shift = shift_all.reshape(O_total, 1).astype(jnp.float32)
    return w_flat, shift


def multiscale_kernels_block(x, packed, *, nb=None, out_dtype=jnp.bfloat16):
    """x: (B, C, L).  Returns (B, 4*out_channels, L) in `out_dtype`."""
    w_flat, shift = packed
    B, C, L = x.shape
    O_total, KC_pad = w_flat.shape
    if nb is None:
        nb = 2 if B % 2 == 0 else 1                         # amortize per-step overhead
    assert B % nb == 0, (B, nb)

    # Explicit scoped-VMEM budget: double-buffered x/out blocks + grid-invariant
    # operands + in-kernel xcol/acc intermediates + headroom.
    x_block = nb * C * L * jnp.dtype(x.dtype).itemsize
    out_block = nb * O_total * L * jnp.dtype(out_dtype).itemsize
    w_bytes = w_flat.size * 2
    sh_bytes = shift.size * 4
    xcol_bytes = KC_pad * nb * L * 2
    acc_bytes = O_total * nb * L * 4
    vmem_limit = min(
        2 * (x_block + out_block) + w_bytes + sh_bytes + 2 * (xcol_bytes + acc_bytes)
        + (8 << 20),
        100 << 20)

    return pl.pallas_call(
        _msk_kernel,
        out_shape=jax.ShapeDtypeStruct((B, O_total, L), out_dtype),
        grid_spec=pltpu.PrefetchScalarGridSpec(
            num_scalar_prefetch=0,
            grid=(B // nb,),
            in_specs=[
                pl.BlockSpec((nb, C, L), lambda b: (b, 0, 0)),          # x block
                pl.BlockSpec((O_total, KC_pad), lambda b: (0, 0)),      # grid-invariant
                pl.BlockSpec((O_total, 1), lambda b: (0, 0)),           # grid-invariant
            ],
            out_specs=pl.BlockSpec((nb, O_total, L), lambda b: (b, 0, 0)),
        ),
        compiler_params=pltpu.CompilerParams(
            dimension_semantics=("parallel",),
            vmem_limit_bytes=int(vmem_limit)),
    )(x, w_flat, shift)


def make_params(key, in_channels, out_channels):
    """Synthetic parameters for the 4 ConvolutionLayer branches, with BN(eval)
    folded into per-output-channel scale/shift and taps zero-padded to K_MAX."""
    ksizes = (3, 5, 9, 15)
    w_list, scale_list, shift_list = [], [], []
    keys = jax.random.split(key, len(ksizes))
    for kk, ksz in zip(keys, ksizes):
        k1, k2, k3, k4, k5, k6 = jax.random.split(kk, 6)
        fan_in = in_channels * ksz
        bound = 1.0 / jnp.sqrt(fan_in)
        w = jax.random.uniform(k1, (out_channels, in_channels, ksz),
                               jnp.float32, -bound, bound)
        b = jax.random.uniform(k2, (out_channels,), jnp.float32, -bound, bound)
        gamma = 1.0 + 0.1 * jax.random.normal(k3, (out_channels,), jnp.float32)
        beta = 0.1 * jax.random.normal(k4, (out_channels,), jnp.float32)
        run_mean = 0.05 * jax.random.normal(k5, (out_channels,), jnp.float32)
        run_var = 1.0 + 0.1 * jax.random.uniform(k6, (out_channels,), jnp.float32)
        lpad = (K_MAX - ksz) // 2                 # centered: valid for odd k + 'same' pad
        w_padded = jnp.pad(w, ((0, 0), (0, 0), (lpad, K_MAX - ksz - lpad)))
        scale = gamma / jnp.sqrt(run_var + BN_EPS)
        shift = scale * (b - run_mean) + beta
        w_list.append(w_padded)
        scale_list.append(scale)
        shift_list.append(shift)
    return (jnp.concatenate(w_list, axis=0),      # (4*O, C, 15)
            jnp.concatenate(scale_list),          # (4*O,)
            jnp.concatenate(shift_list))          # (4*O,)


def reference(x, params, compute_dtype=jnp.float32, fold_scale=False):
    """Pure-JAX reference of the folded block.  With fold_scale=True the BN
    scale is folded into the conv weights before the cast, mirroring the
    kernel's numerics exactly (up to f32 accumulation order)."""
    w_all, scale_all, shift_all = params
    if fold_scale:
        w = (w_all * scale_all[:, None, None]).astype(compute_dtype)
    else:
        w = w_all.astype(compute_dtype)
    y = lax.conv_general_dilated(
        x.astype(compute_dtype), w,
        window_strides=(1,), padding="SAME",
        dimension_numbers=("NCH", "OIH", "NCH"),
        preferred_element_type=jnp.float32)
    if not fold_scale:
        y = y * scale_all[None, :, None]
    y = y + shift_all[None, :, None]
    return jnp.maximum(y, LEAKY_SLOPE * y)


if __name__ == "__main__":
    B, C_IN, OUT_CH, L = 2, 4, 8, 256              # L multiple of 128 -> lane-dense stores
    key = jax.random.PRNGKey(0)
    kx, kp = jax.random.split(key)
    x = jax.random.normal(kx, (B, C_IN, L), jnp.float32)
    params = make_params(kp, C_IN, OUT_CH)
    packed = pack_params(params)

    out = jax.block_until_ready(multiscale_kernels_block(x, packed))
    assert out.shape == (B, 4 * OUT_CH, L), out.shape
    assert out.dtype == jnp.bfloat16, out.dtype
    out_f32 = out.astype(jnp.float32)

    # Tight check: reference with the same folded-bf16 weights / bf16 inputs
    # (difference = f32 accumulation order + bf16 output rounding).
    ref_bf = reference(x, params, compute_dtype=jnp.bfloat16, fold_scale=True)
    assert jnp.allclose(out_f32, ref_bf, atol=3e-2, rtol=3e-2), \
        float(jnp.max(jnp.abs(out_f32 - ref_bf)))
    # Loose sanity check against the full-f32 unfolded reference.
    ref_f32 = reference(x, params, compute_dtype=jnp.float32)
    assert jnp.allclose(out_f32, ref_f32, atol=1e-1, rtol=1e-1), \
        float(jnp.max(jnp.abs(out_f32 - ref_f32)))
    print("KERNEL_OK")
</pallas_src>

<mosaic_0001>
module attributes {stable_mosaic.version = 11 : i64} {
  func.func @_msk_kernel(%arg0: i32, %arg1: memref<2x4x256xf32, #tpu.memory_space<vmem>>, %arg2: memref<32x120xbf16, #tpu.memory_space<vmem>>, %arg3: memref<32x1xf32, #tpu.memory_space<vmem>>, %arg4: memref<2x32x256xbf16, #tpu.memory_space<vmem>>) attributes {dimension_semantics = [#tpu.dimension_semantics<parallel>], iteration_bounds = array<i64: 1>, scalar_prefetch = 0 : i64, scratch_operands = 0 : i64, tpu.core_type = #tpu.core_type<tc>, window_params = [{transform_indices = @transform_0, window_bounds = array<i64: 2, 4, 256>}, {pipeline_mode = #tpu.pipeline_mode<synchronous>, transform_indices = @transform_1, window_bounds = array<i64: 32, 120>}, {pipeline_mode = #tpu.pipeline_mode<synchronous>, transform_indices = @transform_2, window_bounds = array<i64: 32, 1>}, {transform_indices = @transform_3, window_bounds = array<i64: 2, 32, 256>}]} {
    %cst = arith.constant 0.000000e+00 : bf16
    %0 = vector.broadcast %cst : bf16 to vector<4x256xbf16>
    %cst_0 = arith.constant 0.000000e+00 : bf16
    %1 = vector.broadcast %cst_0 : bf16 to vector<8x7xbf16>
    %c0 = arith.constant 0 : index
    %c0_1 = arith.constant 0 : index
    %c0_2 = arith.constant 0 : index
    %2 = vector.load %arg1[%c0, %c0_1, %c0_2] : memref<2x4x256xf32, #tpu.memory_space<vmem>>, vector<1x4x256xf32>
    %3 = vector.shape_cast %2 : vector<1x4x256xf32> to vector<4x256xf32>
    %4 = arith.truncf %3 : vector<4x256xf32> to vector<4x256xbf16>
    %5 = tpu.concatenate %4, %0 in 0 : vector<4x256xbf16>, vector<4x256xbf16> -> vector<8x256xbf16>
    %6 = tpu.concatenate %1, %5, %1 in 1 : vector<8x7xbf16>, vector<8x256xbf16>, vector<8x7xbf16> -> vector<8x270xbf16>
    %7 = vector.extract_strided_slice %6 {offsets = [0, 0], sizes = [8, 256], strides = [1, 1]} : vector<8x270xbf16> to vector<8x256xbf16>
    %8 = vector.extract_strided_slice %6 {offsets = [0, 1], sizes = [8, 256], strides = [1, 1]} : vector<8x270xbf16> to vector<8x256xbf16>
    %9 = vector.extract_strided_slice %6 {offsets = [0, 2], sizes = [8, 256], strides = [1, 1]} : vector<8x270xbf16> to vector<8x256xbf16>
    %10 = vector.extract_strided_slice %6 {offsets = [0, 3], sizes = [8, 256], strides = [1, 1]} : vector<8x270xbf16> to vector<8x256xbf16>
    %11 = vector.extract_strided_slice %6 {offsets = [0, 4], sizes = [8, 256], strides = [1, 1]} : vector<8x270xbf16> to vector<8x256xbf16>
    %12 = vector.extract_strided_slice %6 {offsets = [0, 5], sizes = [8, 256], strides = [1, 1]} : vector<8x270xbf16> to vector<8x256xbf16>
    %13 = vector.extract_strided_slice %6 {offsets = [0, 6], sizes = [8, 256], strides = [1, 1]} : vector<8x270xbf16> to vector<8x256xbf16>
    %14 = vector.extract_strided_slice %6 {offsets = [0, 7], sizes = [8, 256], strides = [1, 1]} : vector<8x270xbf16> to vector<8x256xbf16>
    %15 = vector.extract_strided_slice %6 {offsets = [0, 8], sizes = [8, 256], strides = [1, 1]} : vector<8x270xbf16> to vector<8x256xbf16>
    %16 = vector.extract_strided_slice %6 {offsets = [0, 9], sizes = [8, 256], strides = [1, 1]} : vector<8x270xbf16> to vector<8x256xbf16>
    %17 = vector.extract_strided_slice %6 {offsets = [0, 10], sizes = [8, 256], strides = [1, 1]} : vector<8x270xbf16> to vector<8x256xbf16>
    %18 = vector.extract_strided_slice %6 {offsets = [0, 11], sizes = [8, 256], strides = [1, 1]} : vector<8x270xbf16> to vector<8x256xbf16>
    %19 = vector.extract_strided_slice %6 {offsets = [0, 12], sizes = [8, 256], strides = [1, 1]} : vector<8x270xbf16> to vector<8x256xbf16>
    %20 = vector.extract_strided_slice %6 {offsets = [0, 13], sizes = [8, 256], strides = [1, 1]} : vector<8x270xbf16> to vector<8x256xbf16>
    %21 = vector.extract_strided_slice %6 {offsets = [0, 14], sizes = [8, 256], strides = [1, 1]} : vector<8x270xbf16> to vector<8x256xbf16>
    %22 = tpu.concatenate %7, %8, %9, %10, %11, %12, %13, %14, %15, %16, %17, %18, %19, %20, %21 in 0 : vector<8x256xbf16>, vector<8x256xbf16>, vector<8x256xbf16>, vector<8x256xbf16>, vector<8x256xbf16>, vector<8x256xbf16>, vector<8x256xbf16>, vector<8x256xbf16>, vector<8x256xbf16>, vector<8x256xbf16>, vector<8x256xbf16>, vector<8x256xbf16>, vector<8x256xbf16>, vector<8x256xbf16>, vector<8x256xbf16> -> vector<120x256xbf16>
    %c1 = arith.constant 1 : index
    %c0_3 = arith.constant 0 : index
    %c0_4 = arith.constant 0 : index
    %23 = vector.load %arg1[%c1, %c0_3, %c0_4] : memref<2x4x256xf32, #tpu.memory_space<vmem>>, vector<1x4x256xf32>
    %24 = vector.shape_cast %23 : vector<1x4x256xf32> to vector<4x256xf32>
    %25 = arith.truncf %24 : vector<4x256xf32> to vector<4x256xbf16>
    %26 = tpu.concatenate %25, %0 in 0 : vector<4x256xbf16>, vector<4x256xbf16> -> vector<8x256xbf16>
    %27 = tpu.concatenate %1, %26, %1 in 1 : vector<8x7xbf16>, vector<8x256xbf16>, vector<8x7xbf16> -> vector<8x270xbf16>
    %28 = vector.extract_strided_slice %27 {offsets = [0, 0], sizes = [8, 256], strides = [1, 1]} : vector<8x270xbf16> to vector<8x256xbf16>
    %29 = vector.extract_strided_slice %27 {offsets = [0, 1], sizes = [8, 256], strides = [1, 1]} : vector<8x270xbf16> to vector<8x256xbf16>
    %30 = vector.extract_strided_slice %27 {offsets = [0, 2], sizes = [8, 256], strides = [1, 1]} : vector<8x270xbf16> to vector<8x256xbf16>
    %31 = vector.extract_strided_slice %27 {offsets = [0, 3], sizes = [8, 256], strides = [1, 1]} : vector<8x270xbf16> to vector<8x256xbf16>
    %32 = vector.extract_strided_slice %27 {offsets = [0, 4], sizes = [8, 256], strides = [1, 1]} : vector<8x270xbf16> to vector<8x256xbf16>
    %33 = vector.extract_strided_slice %27 {offsets = [0, 5], sizes = [8, 256], strides = [1, 1]} : vector<8x270xbf16> to vector<8x256xbf16>
    %34 = vector.extract_strided_slice %27 {offsets = [0, 6], sizes = [8, 256], strides = [1, 1]} : vector<8x270xbf16> to vector<8x256xbf16>
    %35 = vector.extract_strided_slice %27 {offsets = [0, 7], sizes = [8, 256], strides = [1, 1]} : vector<8x270xbf16> to vector<8x256xbf16>
    %36 = vector.extract_strided_slice %27 {offsets = [0, 8], sizes = [8, 256], strides = [1, 1]} : vector<8x270xbf16> to vector<8x256xbf16>
    %37 = vector.extract_strided_slice %27 {offsets = [0, 9], sizes = [8, 256], strides = [1, 1]} : vector<8x270xbf16> to vector<8x256xbf16>
    %38 = vector.extract_strided_slice %27 {offsets = [0, 10], sizes = [8, 256], strides = [1, 1]} : vector<8x270xbf16> to vector<8x256xbf16>
    %39 = vector.extract_strided_slice %27 {offsets = [0, 11], sizes = [8, 256], strides = [1, 1]} : vector<8x270xbf16> to vector<8x256xbf16>
    %40 = vector.extract_strided_slice %27 {offsets = [0, 12], sizes = [8, 256], strides = [1, 1]} : vector<8x270xbf16> to vector<8x256xbf16>
    %41 = vector.extract_strided_slice %27 {offsets = [0, 13], sizes = [8, 256], strides = [1, 1]} : vector<8x270xbf16> to vector<8x256xbf16>
    %42 = vector.extract_strided_slice %27 {offsets = [0, 14], sizes = [8, 256], strides = [1, 1]} : vector<8x270xbf16> to vector<8x256xbf16>
    %43 = tpu.concatenate %28, %29, %30, %31, %32, %33, %34, %35, %36, %37, %38, %39, %40, %41, %42 in 0 : vector<8x256xbf16>, vector<8x256xbf16>, vector<8x256xbf16>, vector<8x256xbf16>, vector<8x256xbf16>, vector<8x256xbf16>, vector<8x256xbf16>, vector<8x256xbf16>, vector<8x256xbf16>, vector<8x256xbf16>, vector<8x256xbf16>, vector<8x256xbf16>, vector<8x256xbf16>, vector<8x256xbf16>, vector<8x256xbf16> -> vector<120x256xbf16>
    %44 = tpu.concatenate %22, %43 in 1 : vector<120x256xbf16>, vector<120x256xbf16> -> vector<120x512xbf16>
    %c0_5 = arith.constant 0 : index
    %c0_6 = arith.constant 0 : index
    %45 = vector.load %arg2[%c0_5, %c0_6] : memref<32x120xbf16, #tpu.memory_space<vmem>>, vector<32x120xbf16>
    %cst_7 = arith.constant dense<0.000000e+00> : vector<32x512xf32>
    %46 = tpu.matmul %45, %44, %cst_7 {dimension_numbers = #tpu.dot_dimension_numbers<[1], [0], [0], [1], [0, 0, 1, 1], [], []>} : vector<32x120xbf16>, vector<120x512xbf16>, vector<32x512xf32> -> vector<32x512xf32>
    %c0_8 = arith.constant 0 : index
    %c0_9 = arith.constant 0 : index
    %47 = vector.load %arg3[%c0_8, %c0_9] : memref<32x1xf32, #tpu.memory_space<vmem>>, vector<32x1xf32>
    %48 = vector.broadcast %47 : vector<32x1xf32> to vector<32x512xf32>
    %49 = arith.addf %46, %48 : vector<32x512xf32>
    %cst_10 = arith.constant 0.00999999977 : f32
    %50 = vector.broadcast %cst_10 : f32 to vector<32x512xf32>
    %51 = arith.mulf %50, %49 : vector<32x512xf32>
    %52 = arith.maximumf %49, %51 : vector<32x512xf32>
    %53 = arith.truncf %52 : vector<32x512xf32> to vector<32x512xbf16>
    %54 = vector.extract_strided_slice %53 {offsets = [0, 0], sizes = [32, 256], strides = [1, 1]} : vector<32x512xbf16> to vector<32x256xbf16>
    %c0_11 = arith.constant 0 : index
    %c0_12 = arith.constant 0 : index
    %c0_13 = arith.constant 0 : index
    %55 = vector.load %arg4[%c0_11, %c0_12, %c0_13] : memref<2x32x256xbf16, #tpu.memory_space<vmem>>, vector<1x32x256xbf16>
    %56 = vector.shape_cast %55 : vector<1x32x256xbf16> to vector<32x256xbf16>
    %57 = vector.shape_cast %54 : vector<32x256xbf16> to vector<1x32x256xbf16>
    tpu.vector_store %arg4[%c0_11, %c0_12, %c0_13], %57 {strides = array<i32>} : memref<2x32x256xbf16, #tpu.memory_space<vmem>>, vector<1x32x256xbf16>,
    %58 = vector.extract_strided_slice %53 {offsets = [0, 256], sizes = [32, 256], strides = [1, 1]} : vector<32x512xbf16> to vector<32x256xbf16>
    %c1_14 = arith.constant 1 : index
    %c0_15 = arith.constant 0 : index
    %c0_16 = arith.constant 0 : index
    %59 = vector.load %arg4[%c1_14, %c0_15, %c0_16] : memref<2x32x256xbf16, #tpu.memory_space<vmem>>, vector<1x32x256xbf16>
    %60 = vector.shape_cast %59 : vector<1x32x256xbf16> to vector<32x256xbf16>
    %61 = vector.shape_cast %58 : vector<32x256xbf16> to vector<1x32x256xbf16>
    tpu.vector_store %arg4[%c1_14, %c0_15, %c0_16], %61 {strides = array<i32>} : memref<2x32x256xbf16, #tpu.memory_space<vmem>>, vector<1x32x256xbf16>,
    return
  }
  func.func @transform_0(%arg0: i32) -> (i32, i32, i32) {
    %c0_i32 = arith.constant 0 : i32
    %c0_i32_0 = arith.constant 0 : i32
    %c0_i32_1 = arith.constant 0 : i32
    return %arg0, %c0_i32, %c0_i32_0 : i32, i32, i32
  }
  func.func @transform_1(%arg0: i32) -> (i32, i32) {
    %c0_i32 = arith.constant 0 : i32
    %c0_i32_0 = arith.constant 0 : i32
    %c0_i32_1 = arith.constant 0 : i32
    return %c0_i32, %c0_i32_0 : i32, i32
  }
  func.func @transform_2(%arg0: i32) -> (i32, i32) {
    %c0_i32 = arith.constant 0 : i32
    %c0_i32_0 = arith.constant 0 : i32
    %c0_i32_1 = arith.constant 0 : i32
    return %c0_i32, %c0_i32_0 : i32, i32
  }
  func.func @transform_3(%arg0: i32) -> (i32, i32, i32) {
    %c0_i32 = arith.constant 0 : i32
    %c0_i32_0 = arith.constant 0 : i32
    %c0_i32_1 = arith.constant 0 : i32
    return %arg0, %c0_i32, %c0_i32_0 : i32, i32, i32
  }
}

</mosaic_0001>

<bundles_post_ra>
// kernel: tpu_custom_call.1
= control target key start
LH: loop header
LB: loop body
LE: loop exit
PB: predicated region body
PF: predicated region fallthrough
CT: control target
= control target key end

     0   :  { %vm22_vm0 = vcmask 1041408   ;;  %s1186_s0 = inlined_call_operand.vmem [shape: f32[2,4,256], index: 0, kind: input, shape index: {}]   ;;  %s1187_s1 = inlined_call_operand.vmem [shape: bf16[32,120], index: 1, kind: input, shape index: {}]   ;;  %s1188_s2 = inlined_call_operand.vmem [shape: f32[32,1], index: 2, kind: input, shape index: {}]   ;;  %s1189_s3 = inlined_call_operand.hbm [shape: bf16[2,32,256], index: 3, kind: output, shape index: {}]  }
   0x1   :  { %v690_v0 = vld [vmem:[%s1186_s0 + $0x8] sm:$0xff]  ;;  %v16_v1 = vld [vmem:[%s1186_s0] sm:$0xff] }
   0x2   :  { %v233_v2 = vpack.c.bf16 %v690_v0, %v690_v0  ;;  %v20_v3 = vpack.c.bf16 %v16_v1, %v16_v1  ;;  %v231_v4 = vcombine.high %v690_v0, %v690_v0  ;;  %v18_v5 = vcombine.high %v16_v1, %v16_v1 }
   0x3   :  { %8 = vsyncpa [#allocation3], 0  ;;  %s762_s16 = smov 7   ;;  %vm34_vm1 = vcmask 56320   ;;  %s763_s0 = smov 114   ;;  %vm169_vm2 = vcmask 932864  }
   0x4   :  { %v236_v6 = vsel %vm22_vm0, %v233_v2, 0  ;;  %v25_v7 = vsel %vm22_vm0, %v20_v3, 0  ;;  %v234_v8 = vpack.c.bf16 %v231_v4, %v231_v4  ;;  %v21_v9 = vpack.c.bf16 %v18_v5, %v18_v5  ;;  %s764_s17 = smov 116   ;;  %s765_s18 = smov 118   ;;  %v426_v61 = vld [vmem:[%s1188_s2] sm:$0xff]  ;;  %v427_v62 = vld [vmem:[%s1188_s2 + $0x8] sm:$0xff] }
   0x5   :  { %241 = vrot.lane.b32.xlu1 %v236_v6, %s762_s16  ;;  %30 = vrot.lane.b32.xlu0 %v25_v7, %s762_s16  ;;  %s766_s19 = smov 120   ;;  %s767_s20 = smov 115   ;;  %vm172_vm3 = vcmask 1043456   ;;  %v776_v53 = vmov 0   ;;  %v428_v1 = vld [vmem:[%s1188_s2 + $0x10] sm:$0xff]  ;;  %v429_v2 = vld [vmem:[%s1188_s2 + $0x18] sm:$0xff] }
   0x6   :  { %v238_v10 = vsel %vm22_vm0, %v234_v8, 0  ;;  %v27_v11 = vsel %vm22_vm0, %v21_v9, 0  ;;  %s768_s21 = smov 122   ;;  %s769_s22 = smov 117   ;;  %511 = vmatprep.mubr.bf16.mxu0 %v776_v53  ;;  %564 = vmatprep.mubr.bf16.mxu1 %v776_v53  ;;  %vm151_vm4 = vcmask 949248   ;;  %vm160_vm5 = vcmask 941056  }
   0x7   :  { %s770_s23 = smov 119   ;;  %s771_s24 = smov 121   ;;  %734 = vset.pattern.permute.xlu0 %v776_v53  ;;  %735 = vset.pattern.permute.xlu1 %v776_v53  ;;  %vm133_vm6 = vcmask 965632   ;;  %vm142_vm7 = vcmask 957440   ;;  %vm115_vm8 = vcmask 982016   ;;  %vm124_vm9 = vcmask 973824  }
   0x8   :  { %s772_s25 = smov 124   ;;  %s773_s26 = smov 123   ;;  %vm97_vm10 = vcmask 998400   ;;  %vm106_vm11 = vcmask 990208   ;;  %vm79_vm12 = vcmask 1014784   ;;  %vm88_vm13 = vcmask 1006592  }
   0x9   :  { %243 = vrot.lane.b32.xlu1 %v238_v10, %s762_s16  ;;  %32 = vrot.lane.b32.xlu0 %v27_v11, %s762_s16  ;;  %s774_s27 = smov 126   ;;  %s775_s28 = smov 125   ;;  %vm61_vm14 = vcmask 1031168   ;;  %vm70_vm15 = vcmask 1022976   ;;  %vm52_vm0 = vcmask 1039360  }
   0xa   :  { %s777_s29 = smov 127  }
  0x77   :  { %v242_v12 = vpop.permute.xlu1 %241  ;;  %v31_v13 = vpop.permute.xlu0 %30 }
  0x78   :  { %v812_v14 = vsel %vm34_vm1, 0, %v242_v12  ;;  %v815_v15 = vsel %vm34_vm1, 0, %v31_v13 }
  0x79   :  { %359 = vrot.lane.b32.xlu1 %v812_v14, %s763_s0  ;;  %163 = vrot.lane.b32.xlu0 %v815_v15, %s763_s0  ;;  %v847_v21 = vrot.slane %v815_v15, 4  ;;  %v853_v22 = vrot.slane %v812_v14, 4 }
  0x7b   :  { %v33_v16 = vpop.permute.xlu0 %32  ;;  %v244_v18 = vpop.permute.xlu1 %243 }
  0x7c   :  { %v822_v17 = vsel %vm34_vm1, %v31_v13, %v33_v16  ;;  %v829_v19 = vsel %vm34_vm1, %v244_v18, 0  ;;  %v836_v20 = vsel %vm34_vm1, %v33_v16, 0  ;;  %v869_v23 = vsel %vm34_vm1, %v242_v12, %v244_v18 }
  0x7d   :  { %145 = vrot.lane.b32.xlu0 %v815_v15, %s764_s17  ;;  %165 = vrot.lane.b32.xlu1 %v822_v17, %s763_s0  ;;  %v906_v24 = vrot.slane %v822_v17, 4  ;;  %v909_v25 = vrot.slane %v836_v20, 4  ;;  %v916_v26 = vrot.slane %v869_v23, 4  ;;  %v919_v27 = vrot.slane %v829_v19, 4 }
  0x81   :  { %343 = vrot.lane.b32.xlu0 %v812_v14, %s764_s17  ;;  %363 = vrot.lane.b32.xlu1 %v829_v19, %s763_s0 }
  0x85   :  { %127 = vrot.lane.b32.xlu0 %v815_v15, %s765_s18  ;;  %149 = vrot.lane.b32.xlu1 %v836_v20, %s764_s17 }
  0x89   :  { %327 = vrot.lane.b32.xlu0 %v812_v14, %s765_s18  ;;  %347 = vrot.lane.b32.xlu1 %v829_v19, %s764_s17 }
  0x8d   :  { %109 = vrot.lane.b32.xlu0 %v815_v15, %s766_s19  ;;  %154 = vrot.lane.b32.xlu1 %v847_v21, %s767_s20 }
  0x91   :  { %311 = vrot.lane.b32.xlu0 %v812_v14, %s766_s19  ;;  %351 = vrot.lane.b32.xlu1 %v853_v22, %s767_s20 }
  0x95   :  { %91 = vrot.lane.b32.xlu0 %v815_v15, %s768_s21  ;;  %131 = vrot.lane.b32.xlu1 %v836_v20, %s765_s18 }
  0x99   :  { %295 = vrot.lane.b32.xlu0 %v812_v14, %s768_s21  ;;  %331 = vrot.lane.b32.xlu1 %v829_v19, %s765_s18 }
  0x9d   :  { %167 = vrot.lane.b32.xlu0 %v836_v20, %s763_s0  ;;  %136 = vrot.lane.b32.xlu1 %v847_v21, %s769_s22 }
  0xa1   :  { %361 = vrot.lane.b32.xlu0 %v869_v23, %s763_s0  ;;  %335 = vrot.lane.b32.xlu1 %v853_v22, %s769_s22 }
  0xa5   :  { %147 = vrot.lane.b32.xlu0 %v822_v17, %s764_s17  ;;  %113 = vrot.lane.b32.xlu1 %v836_v20, %s766_s19 }
  0xa9   :  { %345 = vrot.lane.b32.xlu0 %v869_v23, %s764_s17  ;;  %315 = vrot.lane.b32.xlu1 %v829_v19, %s766_s19 }
  0xad   :  { %129 = vrot.lane.b32.xlu0 %v822_v17, %s765_s18  ;;  %118 = vrot.lane.b32.xlu1 %v847_v21, %s770_s23 }
  0xb1   :  { %329 = vrot.lane.b32.xlu0 %v869_v23, %s765_s18  ;;  %319 = vrot.lane.b32.xlu1 %v853_v22, %s770_s23 }
  0xb5   :  { %111 = vrot.lane.b32.xlu0 %v822_v17, %s766_s19  ;;  %95 = vrot.lane.b32.xlu1 %v836_v20, %s768_s21 }
  0xb9   :  { %313 = vrot.lane.b32.xlu0 %v869_v23, %s766_s19  ;;  %299 = vrot.lane.b32.xlu1 %v829_v19, %s768_s21 }
  0xbd   :  { %93 = vrot.lane.b32.xlu0 %v822_v17, %s768_s21  ;;  %100 = vrot.lane.b32.xlu1 %v847_v21, %s771_s24 }
  0xc1   :  { %297 = vrot.lane.b32.xlu0 %v869_v23, %s768_s21  ;;  %303 = vrot.lane.b32.xlu1 %v853_v22, %s771_s24 }
  0xc5   :  { %75 = vrot.lane.b32.xlu0 %v822_v17, %s772_s25  ;;  %77 = vrot.lane.b32.xlu1 %v836_v20, %s772_s25 }
  0xc9   :  { %281 = vrot.lane.b32.xlu0 %v869_v23, %s772_s25  ;;  %283 = vrot.lane.b32.xlu1 %v829_v19, %s772_s25 }
  0xcd   :  { %158 = vrot.lane.b32.xlu1 %v909_v25, %s767_s20  ;;  %156 = vrot.lane.b32.xlu0 %v906_v24, %s767_s20 }
  0xd1   :  { %355 = vrot.lane.b32.xlu1 %v919_v27, %s767_s20  ;;  %353 = vrot.lane.b32.xlu0 %v916_v26, %s767_s20 }
  0xd5   :  { %140 = vrot.lane.b32.xlu1 %v909_v25, %s769_s22  ;;  %138 = vrot.lane.b32.xlu0 %v906_v24, %s769_s22 }
  0xd9   :  { %339 = vrot.lane.b32.xlu1 %v919_v27, %s769_s22  ;;  %337 = vrot.lane.b32.xlu0 %v916_v26, %s769_s22 }
  0xdd   :  { %122 = vrot.lane.b32.xlu1 %v909_v25, %s770_s23  ;;  %120 = vrot.lane.b32.xlu0 %v906_v24, %s770_s23 }
  0xe1   :  { %323 = vrot.lane.b32.xlu1 %v919_v27, %s770_s23  ;;  %321 = vrot.lane.b32.xlu0 %v916_v26, %s770_s23 }
  0xe5   :  { %104 = vrot.lane.b32.xlu1 %v909_v25, %s771_s24  ;;  %102 = vrot.lane.b32.xlu0 %v906_v24, %s771_s24 }
  0xe9   :  { %307 = vrot.lane.b32.xlu1 %v919_v27, %s771_s24  ;;  %305 = vrot.lane.b32.xlu0 %v916_v26, %s771_s24 }
  0xeb   :  { %v360_v28 = vpop.permute.xlu1 %359  ;;  %v164_v29 = vpop.permute.xlu0 %163 }
  0xed   :  { %86 = vrot.lane.b32.xlu1 %v909_v25, %s773_s26  ;;  %84 = vrot.lane.b32.xlu0 %v906_v24, %s773_s26 }
  0xef   :  { %v166_v30 = vpop.permute.xlu1 %165  ;;  %v947_v31 = vpop.permute.xlu0 %145 }
  0xf0   :  { %v170_v48 = vsel %vm169_vm2, %v164_v29, %v166_v30 }
  0xf1   :  { %291 = vrot.lane.b32.xlu1 %v919_v27, %s773_s26  ;;  %289 = vrot.lane.b32.xlu0 %v916_v26, %s773_s26  ;;  %v468_v50 = vsel %vm172_vm3, %v170_v48, 0 }
  0xf3   :  { %v364_v32 = vpop.permute.xlu1 %363  ;;  %v951_v33 = vpop.permute.xlu0 %343 }
  0xf5   :  { %82 = vrot.lane.b32.xlu1 %v847_v21, %s773_s26  ;;  %73 = vrot.lane.b32.xlu0 %v815_v15, %s772_s25 }
  0xf7   :  { %v956_v34 = vpop.permute.xlu1 %149  ;;  %v958_v35 = vpop.permute.xlu0 %127 }
  0xf9   :  { %287 = vrot.lane.b32.xlu1 %v853_v22, %s773_s26  ;;  %279 = vrot.lane.b32.xlu0 %v812_v14, %s772_s25 }
  0xfb   :  { %v963_v36 = vpop.permute.xlu1 %347  ;;  %v965_v37 = vpop.permute.xlu0 %327 }
  0xfd   :  { %59 = vrot.lane.b32.xlu1 %v836_v20, %s774_s27  ;;  %57 = vrot.lane.b32.xlu0 %v822_v17, %s774_s27 }
  0xff   :  { %v969_v38 = vpop.permute.xlu1 %154  ;;  %v971_v39 = vpop.permute.xlu0 %109 }
 0x101   :  { %68 = vrot.lane.b32.xlu1 %v909_v25, %s775_s28  ;;  %66 = vrot.lane.b32.xlu0 %v906_v24, %s775_s28 }
 0x103   :  { %v975_v40 = vpop.permute.xlu1 %351  ;;  %v977_v41 = vpop.permute.xlu0 %311 }
 0x105   :  { %267 = vrot.lane.b32.xlu1 %v829_v19, %s774_s27  ;;  %265 = vrot.lane.b32.xlu0 %v869_v23, %s774_s27 }
 0x107   :  { %v981_v42 = vpop.permute.xlu1 %131  ;;  %v983_v43 = vpop.permute.xlu0 %91 }
 0x109   :  { %275 = vrot.lane.b32.xlu1 %v919_v27, %s775_s28  ;;  %273 = vrot.lane.b32.xlu0 %v916_v26, %s775_s28 }
 0x10b   :  { %v987_v44 = vpop.permute.xlu1 %331  ;;  %v989_v45 = vpop.permute.xlu0 %295 }
 0x10d   :  { %64 = vrot.lane.b32.xlu1 %v847_v21, %s775_s28  ;;  %55 = vrot.lane.b32.xlu0 %v815_v15, %s774_s27 }
 0x10f   :  { %v993_v46 = vpop.permute.xlu1 %136  ;;  %v168_v47 = vpop.permute.xlu0 %167 }
 0x110   :  { %v171_v49 = vsel %vm169_vm2, %v166_v30, %v168_v47 }
 0x111   :  { %271 = vrot.lane.b32.xlu1 %v853_v22, %s775_s28  ;;  %263 = vrot.lane.b32.xlu0 %v812_v14, %s774_s27 }
 0x112   :  { %693 = vmatprep.subr.msk.bf16.mxu0 %vm172_vm3, %v171_v49 }
 0x113   :  { %480 = vmatpush1.bf16.msra.mxu0 %v468_v50  ;;  %v1001_v51 = vpop.permute.xlu1 %335  ;;  %v362_v52 = vpop.permute.xlu0 %361 }
 0x114   :  { %v366_v54 = vsel %vm169_vm2, %v362_v52, %v364_v32  ;;  %v365_v55 = vsel %vm169_vm2, %v360_v28, %v362_v52 }
 0x115   :  { %50 = vrot.lane.b32.xlu1 %v909_v25, %s777_s29  ;;  %48 = vrot.lane.b32.xlu0 %v906_v24, %s777_s29  ;;  %v474_v56 = vsel %vm172_vm3, %v365_v55, 0 }
 0x116   :  { %696 = vmatprep.subr.msk.bf16.mxu1 %vm172_vm3, %v366_v54 }
 0x117   :  { %533 = vmatpush1.bf16.msra.mxu1 %v474_v56  ;;  %v1013_v57 = vpop.permute.xlu1 %113  ;;  %v148_v58 = vpop.permute.xlu0 %147 }
 0x118   :  { %v153_v24 = vsel %vm151_vm4, %v148_v58, %v956_v34 }
 0x119   :  { %259 = vrot.lane.b32.xlu1 %v919_v27, %s777_s29  ;;  %257 = vrot.lane.b32.xlu0 %v916_v26, %s777_s29 }
 0x11b   :  { %v1017_v59 = vpop.permute.xlu1 %315  ;;  %v346_v60 = vpop.permute.xlu0 %345 }
 0x11c   :  { %v349_v32 = vsel %vm151_vm4, %v951_v33, %v346_v60  ;;  %v350_v47 = vsel %vm151_vm4, %v346_v60, %v963_v36 }
 0x11d   :  { %255 = vrot.lane.b32.xlu1 %v853_v22, %s777_s29  ;;  %46 = vrot.lane.b32.xlu0 %v847_v21, %s777_s29  ;;  %v152_v22 = vsel %vm151_vm4, %v947_v31, %v148_v58 }
 0x11f   :  { %v1027_v63 = vpop.permute.xlu1 %118  ;;  %v130_v0 = vpop.permute.xlu0 %129 }
 0x120   :  { %v134_v33 = vsel %vm133_vm6, %v958_v35, %v130_v0  ;;  %v135_v36 = vsel %vm133_vm6, %v130_v0, %v981_v42 }
 0x121   :  { %432 = vperm.xlu0 %734, %v426_v61   ;;  %437 = vperm.xlu1 %735, %v427_v62  }
 0x123   :  { %v1035_v3 = vpop.permute.xlu1 %319  ;;  %v330_v4 = vpop.permute.xlu0 %329 }
 0x124   :  { %v333_v60 = vsel %vm133_vm6, %v965_v37, %v330_v4  ;;  %v334_v35 = vsel %vm133_vm6, %v330_v4, %v987_v44 }
 0x125   :  { %442 = vperm.xlu1 %735, %v428_v1   ;;  %447 = vperm.xlu0 %734, %v429_v2  }
 0x127   :  { %v1037_v5 = vpop.permute.xlu1 %95  ;;  %v112_v6 = vpop.permute.xlu0 %111 }
 0x128   :  { %v116_v37 = vsel %vm115_vm8, %v971_v39, %v112_v6  ;;  %v117_v44 = vsel %vm115_vm8, %v112_v6, %v1013_v57 }
 0x12b   :  { %v1039_v7 = vpop.permute.xlu1 %299  ;;  %v1041_v8 = vpop.permute.xlu0 %313 }
 0x12c   :  { %v317_v39 = vsel %vm115_vm8, %v977_v41, %v1041_v8  ;;  %v318_v57 = vsel %vm115_vm8, %v1041_v8, %v1017_v59 }
 0x12f   :  { %v1043_v9 = vpop.permute.xlu1 %100  ;;  %v1045_v10 = vpop.permute.xlu0 %93 }
 0x130   :  { %v98_v41 = vsel %vm97_vm10, %v983_v43, %v1045_v10  ;;  %v99_v59 = vsel %vm97_vm10, %v1045_v10, %v1037_v5 }
 0x133   :  { %v1047_v11 = vpop.permute.xlu1 %303  ;;  %v1049_v12 = vpop.permute.xlu0 %297 }
 0x134   :  { %v301_v43 = vsel %vm97_vm10, %v989_v45, %v1049_v12  ;;  %v302_v5 = vsel %vm97_vm10, %v1049_v12, %v1039_v7 }
 0x137   :  { %v1051_v13 = vpop.permute.xlu1 %77  ;;  %v1053_v16 = vpop.permute.xlu0 %75 }
 0x138   :  { %v81_v45 = vsel %vm79_vm12, %v1053_v16, %v1051_v13 }
 0x13b   :  { %v1055_v18 = vpop.permute.xlu1 %283  ;;  %v1057_v19 = vpop.permute.xlu0 %281 }
 0x13f   :  { %v159_v20 = vpop.permute.xlu1 %158  ;;  %v157_v21 = vpop.permute.xlu0 %156 }
 0x140   :  { %v161_v25 = vsel %vm160_vm5, %v969_v38, %v157_v21  ;;  %v162_v26 = vsel %vm160_vm5, %v157_v21, %v159_v20 }
 0x141   :  { %v226_v27 = vsel %vm172_vm3, %v153_v24, %v162_v26  ;;  %v222_v28 = vsel %vm172_vm3, %v152_v22, %v161_v25 }
 0x142   :  { %481 = vmatprep.subr.bf16.mxu0 %v226_v27 }
 0x143   :  { %v356_v29 = vpop.permute.xlu1 %355  ;;  %482 = vmatpush1.bf16.msra.mxu0 %v222_v28  ;;  %v354_v30 = vpop.permute.xlu0 %353 }
 0x144   :  { %v357_v31 = vsel %vm160_vm5, %v975_v40, %v354_v30  ;;  %v358_v34 = vsel %vm160_vm5, %v354_v30, %v356_v29 }
 0x145   :  { %v420_v38 = vsel %vm172_vm3, %v350_v47, %v358_v34  ;;  %v416_v48 = vsel %vm172_vm3, %v349_v32, %v357_v31 }
 0x146   :  { %534 = vmatprep.subr.bf16.mxu1 %v420_v38 }
 0x147   :  { %v141_v49 = vpop.permute.xlu1 %140  ;;  %535 = vmatpush1.bf16.msra.mxu1 %v416_v48  ;;  %v139_v50 = vpop.permute.xlu0 %138 }
 0x148   :  { %v143_v40 = vsel %vm142_vm7, %v993_v46, %v139_v50  ;;  %v144_v52 = vsel %vm142_vm7, %v139_v50, %v141_v49  ;;  %v286_v49 = vsel %vm79_vm12, %v1057_v19, %v1055_v18 }
 0x149   :  { %v218_v54 = vsel %vm172_vm3, %v135_v36, %v144_v52  ;;  %v214_v55 = vsel %vm172_vm3, %v134_v33, %v143_v40 }
 0x14a   :  { %483 = vmatprep.subr.bf16.mxu0 %v218_v54 }
 0x14b   :  { %v340_v56 = vpop.permute.xlu1 %339  ;;  %484 = vmatpush1.bf16.msra.mxu0 %v214_v55  ;;  %v338_v58 = vpop.permute.xlu0 %337 }
 0x14c   :  { %v341_v42 = vsel %vm142_vm7, %v1001_v51, %v338_v58  ;;  %v342_v46 = vsel %vm142_vm7, %v338_v58, %v340_v56 }
 0x14d   :  { %v412_v61 = vsel %vm172_vm3, %v334_v35, %v342_v46  ;;  %v408_v62 = vsel %vm172_vm3, %v333_v60, %v341_v42 }
 0x14e   :  { %536 = vmatprep.subr.bf16.mxu1 %v412_v61 }
 0x14f   :  { %v123_v0 = vpop.permute.xlu1 %122  ;;  %537 = vmatpush1.bf16.msra.mxu1 %v408_v62  ;;  %v121_v1 = vpop.permute.xlu0 %120 }
 0x150   :  { %v125_v51 = vsel %vm124_vm9, %v1027_v63, %v121_v1  ;;  %v126_v2 = vsel %vm124_vm9, %v121_v1, %v123_v0 }
 0x151   :  { %v210_v4 = vsel %vm172_vm3, %v117_v44, %v126_v2  ;;  %v206_v20 = vsel %vm172_vm3, %v116_v37, %v125_v51 }
 0x152   :  { %485 = vmatprep.subr.bf16.mxu0 %v210_v4 }
 0x153   :  { %v324_v21 = vpop.permute.xlu1 %323  ;;  %486 = vmatpush1.bf16.msra.mxu0 %v206_v20  ;;  %v322_v22 = vpop.permute.xlu0 %321 }
 0x154   :  { %v325_v63 = vsel %vm124_vm9, %v1035_v3, %v322_v22  ;;  %v326_v6 = vsel %vm124_vm9, %v322_v22, %v324_v21 }
 0x155   :  { %v404_v24 = vsel %vm172_vm3, %v318_v57, %v326_v6  ;;  %v400_v25 = vsel %vm172_vm3, %v317_v39, %v325_v63 }
 0x156   :  { %538 = vmatprep.subr.bf16.mxu1 %v404_v24 }
 0x157   :  { %v105_v26 = vpop.permute.xlu1 %104  ;;  %539 = vmatpush1.bf16.msra.mxu1 %v400_v25  ;;  %v103_v27 = vpop.permute.xlu0 %102 }
 0x158   :  { %v107_v3 = vsel %vm106_vm11, %v1043_v9, %v103_v27  ;;  %v108_v8 = vsel %vm106_vm11, %v103_v27, %v105_v26 }
 0x159   :  { %v202_v28 = vsel %vm172_vm3, %v99_v59, %v108_v8  ;;  %v198_v29 = vsel %vm172_vm3, %v98_v41, %v107_v3 }
 0x15a   :  { %487 = vmatprep.subr.bf16.mxu0 %v202_v28 }
 0x15b   :  { %v308_v30 = vpop.permute.xlu1 %307  ;;  %488 = vmatpush1.bf16.msra.mxu0 %v198_v29  ;;  %v306_v32 = vpop.permute.xlu0 %305 }
 0x15c   :  { %v309_v9 = vsel %vm106_vm11, %v1047_v11, %v306_v32  ;;  %v310_v10 = vsel %vm106_vm11, %v306_v32, %v308_v30 }
 0x15d   :  { %v396_v47 = vsel %vm172_vm3, %v302_v5, %v310_v10  ;;  %v392_v31 = vsel %vm172_vm3, %v301_v43, %v309_v9 }
 0x15e   :  { %540 = vmatprep.subr.bf16.mxu1 %v396_v47 }
 0x15f   :  { %v87_v34 = vpop.permute.xlu1 %86  ;;  %541 = vmatpush1.bf16.msra.mxu1 %v392_v31  ;;  %v85_v38 = vpop.permute.xlu0 %84 }
 0x160   :  { %v90_v7 = vsel %vm88_vm13, %v85_v38, %v87_v34 }
 0x161   :  { %v194_v11 = vsel %vm172_vm3, %v81_v45, %v90_v7 }
 0x162   :  { %489 = vmatprep.subr.bf16.mxu0 %v194_v11 }
 0x163   :  { %v292_v12 = vpop.permute.xlu1 %291  ;;  %v290_v48 = vpop.permute.xlu0 %289 }
 0x164   :  { %v294_v50 = vsel %vm88_vm13, %v290_v48, %v292_v12 }
 0x165   :  { %v388_v33 = vsel %vm172_vm3, %v286_v49, %v294_v50 }
 0x166   :  { %542 = vmatprep.subr.bf16.mxu1 %v388_v33 }
 0x167   :  { %v83_v36 = vpop.permute.xlu1 %82  ;;  %v74_v40 = vpop.permute.xlu0 %73 }
 0x168   :  { %v89_v13 = vsel %vm88_vm13, %v83_v36, %v85_v38  ;;  %v80_v52 = vsel %vm79_vm12, %v74_v40, %v1053_v16 }
 0x169   :  { %v190_v54 = vsel %vm172_vm3, %v80_v52, %v89_v13 }
 0x16a   :  { %490 = vmatpush1.bf16.msra.mxu0 %v190_v54 }
 0x16b   :  { %v288_v55 = vpop.permute.xlu1 %287  ;;  %v280_v56 = vpop.permute.xlu0 %279 }
 0x16c   :  { %v293_v58 = vsel %vm88_vm13, %v288_v55, %v290_v48  ;;  %v285_v18 = vsel %vm79_vm12, %v280_v56, %v1057_v19 }
 0x16d   :  { %v384_v60 = vsel %vm172_vm3, %v285_v18, %v293_v58 }
 0x16e   :  { %543 = vmatpush1.bf16.msra.mxu1 %v384_v60 }
 0x16f   :  { %v60_v35 = vpop.permute.xlu1 %59  ;;  %v58_v42 = vpop.permute.xlu0 %57 }
 0x170   :  { %v63_v16 = vsel %vm61_vm14, %v58_v42, %v60_v35 }
 0x173   :  { %v69_v46 = vpop.permute.xlu1 %68  ;;  %v67_v61 = vpop.permute.xlu0 %66 }
 0x174   :  { %v72_v62 = vsel %vm70_vm15, %v67_v61, %v69_v46 }
 0x175   :  { %v186_v0 = vsel %vm172_vm3, %v63_v16, %v72_v62 }
 0x176   :  { %491 = vmatprep.subr.bf16.mxu0 %v186_v0 }
 0x177   :  { %v268_v1 = vpop.permute.xlu1 %267  ;;  %v266_v37 = vpop.permute.xlu0 %265 }
 0x178   :  { %v270_v51 = vsel %vm61_vm14, %v266_v37, %v268_v1 }
 0x17b   :  { %v276_v44 = vpop.permute.xlu1 %275  ;;  %v274_v19 = vpop.permute.xlu0 %273 }
 0x17c   :  { %v278_v2 = vsel %vm70_vm15, %v274_v19, %v276_v44 }
 0x17d   :  { %v380_v4 = vsel %vm172_vm3, %v270_v51, %v278_v2 }
 0x17e   :  { %544 = vmatprep.subr.bf16.mxu1 %v380_v4 }
 0x17f   :  { %v65_v20 = vpop.permute.xlu1 %64  ;;  %v56_v21 = vpop.permute.xlu0 %55 }
 0x180   :  { %v71_v22 = vsel %vm70_vm15, %v65_v20, %v67_v61  ;;  %v62_v39 = vsel %vm61_vm14, %v56_v21, %v58_v42 }
 0x181   :  { %v182_v57 = vsel %vm172_vm3, %v62_v39, %v71_v22 }
 0x182   :  { %492 = vmatpush1.bf16.msra.mxu0 %v182_v57 }
 0x183   :  { %v272_v63 = vpop.permute.xlu1 %271  ;;  %v264_v6 = vpop.permute.xlu0 %263 }
 0x184   :  { %v277_v24 = vsel %vm70_vm15, %v272_v63, %v274_v19  ;;  %v269_v25 = vsel %vm61_vm14, %v264_v6, %v266_v37 }
 0x185   :  { %v376_v26 = vsel %vm172_vm3, %v269_v25, %v277_v24 }
 0x186   :  { %545 = vmatpush1.bf16.msra.mxu1 %v376_v26 }
 0x187   :  { %v51_v27 = vpop.permute.xlu1 %50  ;;  %v49_v41 = vpop.permute.xlu0 %48 }
 0x188   :  { %v54_v59 = vsel %vm52_vm0, %v49_v41, %v51_v27 }
 0x189   :  { %v178_v3 = vsel %vm172_vm3, %v822_v17, %v54_v59  ;;  %v738_v17 = vld [vmem:[%s1187_s1] sm:$0xff]  }
 0x18a   :  { %493 = vmatprep.subr.bf16.mxu0 %v178_v3 }
 0x18b   :  { %v260_v8 = vpop.permute.xlu1 %259  ;;  %v258_v28 = vpop.permute.xlu0 %257 }
 0x18c   :  { %v262_v29 = vsel %vm52_vm0, %v258_v28, %v260_v8 }
 0x18d   :  { %v372_v30 = vsel %vm172_vm3, %v869_v23, %v262_v29 }
 0x18e   :  { %546 = vmatprep.subr.bf16.mxu1 %v372_v30 }
 0x18f   :  { %v256_v32 = vpop.permute.xlu1 %255  ;;  %v47_v43 = vpop.permute.xlu0 %46 }
 0x190   :  { %v261_v5 = vsel %vm52_vm0, %v256_v32, %v258_v28  ;;  %v53_v9 = vsel %vm52_vm0, %v47_v43, %v49_v41 }
 0x191   :  { %v174_v10 = vsel %vm172_vm3, %v815_v15, %v53_v9  ;;  %v368_v47 = vsel %vm172_vm3, %v812_v14, %v261_v5  ;;  %v739_v15 = vld [vmem:[%s1187_s1 + $0x8] sm:$0xff]   ;;  %s778_s1 = smov [#allocation2]  }
 0x192   :  { %494 = vmatpush1.bf16.msra.mxu0 %v174_v10  ;;  %547 = vmatpush1.bf16.msra.mxu1 %v368_v47  ;;  %s679_s14 = sshll.u32 %s778_s1, 4  ;;  %s680_s14 = int_to_ptr.vmem [resolvable:$true] %s679_s14 }
 0x193   :  { %s740_s15 = scalar_lea.vmem %s680_s14, 1024  ;;  %p745_p1 = scmp.lt.s32.totalorder %s680_s14, %s680_s14 }
 0x194   :  { %p741_p0 = scmp.ne.s32.totalorder %s680_s14, %s740_s15  ;;  %p746_p2 = scmp.lt.s32.totalorder %s740_s15, %s740_s15 }
 0x195   :  { %694 = vmatmul.mubr.msk.bf16.vlgmr.msra.gmra.mxu0 %vm115_vm8, %v738_v17  ;;  %697 = vmatmul.mubr.msk.bf16.vlgmr.msra.gmra.mxu1 %vm115_vm8, %v738_v17 }
 0x196   :  { %521 = vmatprep.mubr.bf16.mxu0 %v776_v53  ;;  %574 = vmatprep.mubr.bf16.mxu1 %v776_v53  ;;  %p747_p3 = por %p746_p2, %p745_p1 }
 0x198   :  { %p748_p4 = pnand %p747_p3, %p741_p0 }
 0x19c   :  { %v433_v14 = vpop.permute.xlu0 %432  ;;  %v438_v45 = vpop.permute.xlu1 %437 }
 0x19d   :  { %695 = vmatmul.mubr.msk.bf16.gmra.mxu0 %vm115_vm8, %v739_v15  ;;  %698 = vmatmul.mubr.msk.bf16.gmra.mxu1 %vm115_vm8, %v739_v15 }
 0x1a0   :  { %v443_v46 = vpop.permute.xlu1 %442  ;;  %v448_v28 = vpop.permute.xlu0 %447 }
 0x255   :  { %v513_v23 = vpop.f32.mrf.mxu0  ;;  %v566_v31 = vpop.f32.mrf.mxu1 }
 0x256   :  { %v514_v34 = vadd.f32 %v513_v23, %v433_v14  ;;  %v567_v38 = vadd.f32 %v566_v31, %v433_v14 }
 0x257   :  { %v515_v7 = vpop.f32.mrf.mxu0  ;;  %v568_v11 = vpop.f32.mrf.mxu1 }
 0x258   :  { %v585_v12 = vmul.f32 0.01, %v514_v34  ;;  %v587_v48 = vmul.f32 0.01, %v567_v38  ;;  %v516_v49 = vadd.f32 %v515_v7, %v433_v14  ;;  %v569_v53 = vadd.f32 %v568_v11, %v433_v14 }
 0x259   :  { %v517_v50 = vpop.f32.mrf.mxu0  ;;  %v570_v33 = vpop.f32.mrf.mxu1 }
 0x25a   :  { %v586_v36 = vmul.f32 0.01, %v516_v49  ;;  %v588_v40 = vmul.f32 0.01, %v569_v53  ;;  %v601_v13 = vmax.f32 %v514_v34, %v585_v12  ;;  %v603_v52 = vmax.f32 %v567_v38, %v587_v48 }
 0x25b   :  { %v518_v54 = vadd.f32 %v517_v50, %v438_v45  ;;  %v571_v55 = vadd.f32 %v570_v33, %v438_v45  ;;  %v519_v56 = vpop.f32.mrf.mxu0  ;;  %v572_v58 = vpop.f32.mrf.mxu1 }
 0x25c   :  { %v602_v18 = vmax.f32 %v516_v49, %v586_v36  ;;  %v604_v60 = vmax.f32 %v569_v53, %v588_v40  ;;  %v520_v35 = vadd.f32 %v519_v56, %v438_v45  ;;  %v573_v42 = vadd.f32 %v572_v58, %v438_v45 }
 0x25d   :  { %v589_v61 = vmul.f32 0.01, %v518_v54  ;;  %v591_v16 = vmul.f32 0.01, %v571_v55  ;;  %v523_v62 = vpop.f32.mrf.mxu0  ;;  %v576_v0 = vpop.f32.mrf.mxu1 }
 0x25e   :  { %v707_v1 = vpack.c.bf16 %v602_v18, %v601_v13  ;;  %v711_v37 = vpack.c.bf16 %v604_v60, %v603_v52  ;;  %v590_v44 = vmul.f32 0.01, %v520_v35  ;;  %v592_v19 = vmul.f32 0.01, %v573_v42 }
 0x25f   :  { %v605_v51 = vmax.f32 %v518_v54, %v589_v61  ;;  %v607_v2 = vmax.f32 %v571_v55, %v591_v16  ;;  %v524_v4 = vadd.f32 %v523_v62, %v443_v46  ;;  %v577_v20 = vadd.f32 %v576_v0, %v443_v46  ;;  %v525_v21 = vpop.f32.mrf.mxu0  ;;  %v578_v22 = vpop.f32.mrf.mxu1 }
 0x260   :  { %645 = vst [vmem:[#allocation2] sm:$0xff] %v707_v1  ;;  %670 = vst [vmem:[#allocation2 + $0x20] sm:$0xff] %v711_v37  ;;  %v606_v39 = vmax.f32 %v520_v35, %v590_v44  ;;  %v608_v57 = vmax.f32 %v573_v42, %v592_v19  ;;  %v526_v63 = vadd.f32 %v525_v21, %v443_v46 }
 0x261   :  { %v579_v6 = vadd.f32 %v578_v22, %v443_v46  ;;  %v593_v24 = vmul.f32 0.01, %v524_v4  ;;  %v595_v25 = vmul.f32 0.01, %v577_v20  ;;  %v527_v26 = vpop.f32.mrf.mxu0  ;;  %v580_v27 = vpop.f32.mrf.mxu1 }
 0x262   :  { %v708_v41 = vpack.c.bf16 %v606_v39, %v605_v51  ;;  %v712_v59 = vpack.c.bf16 %v608_v57, %v607_v2  ;;  %v594_v3 = vmul.f32 0.01, %v526_v63  ;;  %v528_v32 = vadd.f32 %v527_v26, %v448_v28 }
 0x263   :  { %v596_v8 = vmul.f32 0.01, %v579_v6  ;;  %v609_v29 = vmax.f32 %v524_v4, %v593_v24  ;;  %v611_v30 = vmax.f32 %v577_v20, %v595_v25  ;;  %v581_v43 = vadd.f32 %v580_v27, %v448_v28  ;;  %v529_v5 = vpop.f32.mrf.mxu0  ;;  %v582_v9 = vpop.f32.mrf.mxu1 }
 0x264   :  { %646 = vst [vmem:[#allocation2 + $0x8] sm:$0xff] %v708_v41  ;;  %671 = vst [vmem:[#allocation2 + $0x28] sm:$0xff] %v712_v59  ;;  %v610_v10 = vmax.f32 %v526_v63, %v594_v3  ;;  %v530_v17 = vadd.f32 %v529_v5, %v448_v28  ;;  %v583_v15 = vadd.f32 %v582_v9, %v448_v28  ;;  %v597_v14 = vmul.f32 0.01, %v528_v32 }
 0x265   :  { %v612_v47 = vmax.f32 %v579_v6, %v596_v8  ;;  %v599_v23 = vmul.f32 0.01, %v581_v43 }
 0x266   :  { %v709_v31 = vpack.c.bf16 %v610_v10, %v609_v29  ;;  %v598_v38 = vmul.f32 0.01, %v530_v17  ;;  %v600_v45 = vmul.f32 0.01, %v583_v15  ;;  %v613_v7 = vmax.f32 %v528_v32, %v597_v14 }
 0x267   :  { %v713_v34 = vpack.c.bf16 %v612_v47, %v611_v30  ;;  %v615_v11 = vmax.f32 %v581_v43, %v599_v23 }
 0x268   :  { %647 = vst [vmem:[#allocation2 + $0x10] sm:$0xff] %v709_v31  ;;  %v614_v12 = vmax.f32 %v530_v17, %v598_v38  ;;  %v616_v48 = vmax.f32 %v583_v15, %v600_v45 }
 0x269   :  { %672 = vst [vmem:[#allocation2 + $0x30] sm:$0xff] %v713_v34 }
 0x26a   :  { %v710_v49 = vpack.c.bf16 %v614_v12, %v613_v7  ;;  %v714_v53 = vpack.c.bf16 %v616_v48, %v615_v11 }
 0x26c   :  { %648 = vst [vmem:[#allocation2 + $0x18] sm:$0xff] %v710_v49  ;;  %673 = vst [vmem:[#allocation2 + $0x38] sm:$0xff] %v714_v53 }
 0x26d   :  { %751 = shalt.err (!%p748_p4)
}
 0x26e   :  { %s779_s16 = smov 128   ;;  %s780_s0 = smov 8  }
 0x26f   :  { %685 = dma.vmem_to_hbm [thread:$0]  %s680_s14, 1024, %s1189_s3, [#allocation3], %s779_s16, %s779_s16, %s780_s0  }
 0x270   :  { %760 = dma.done.wait [#allocation3], 1024  }
 0x271   :  { %761 = vsyncadd [#allocation3], 4294966272 }
 0x272   :  { %689 = vsyncpa [#allocation3], 1 }

</bundles_post_ra>
